<compile_context>
chip_gen: v5e
topology: v5e:2x2
jax: 0.10.0
libtpu: 0.0.40
codegen_flags: <defaults>
</compile_context>

<pallas_src>
import jax
import jax.numpy as jnp
from jax import lax
from jax.experimental import pallas as pl
from jax.experimental.pallas import tpu as pltpu


def _round_up(x, m):
    return (x + m - 1) // m * m


# ----------------------------- Pallas kernel --------------------------------
def _make_qnet_kernel(n_cat, out_size):
    def kernel(x_ref, cat_ref, w1n_ref, *rest):
        fused_refs = rest[:n_cat]
        b1_ref, w2_ref, b2_ref, w3_ref, b3_ref, o_ref = rest[n_cat:]

        cdt = w1n_ref.dtype
        tb = x_ref.shape[0]

        # Layer 1 (numeric part): MXU dot with f32 accumulation.
        h1 = jnp.dot(x_ref[...], w1n_ref[...], preferred_element_type=jnp.float32)

        # Fused embedding lookup: one_hot(cat_i) @ (table_i @ W1_emb_i).
        cat = cat_ref[...]                                    # (tb, n_cat) int32
        for i in range(n_cat):
            fref = fused_refs[i]
            cdp = fref.shape[0]                               # cat_dim padded to 8
            iota = lax.broadcasted_iota(jnp.int32, (tb, cdp), 1)
            onehot = (cat[:, i:i + 1] == iota).astype(cdt)    # (tb, cdp)
            h1 = h1 + jnp.dot(onehot, fref[...],
                              preferred_element_type=jnp.float32)

        h1 = jnp.maximum(h1 + b1_ref[...], 0.0)               # bias + ReLU stay f32

        # Layer 2: Linear(128 -> 64, lane-padded to 128) + ReLU.
        h2 = jnp.dot(h1.astype(w2_ref.dtype), w2_ref[...],
                     preferred_element_type=jnp.float32)
        h2 = jnp.maximum(h2 + b2_ref[...], 0.0)

        # Layer 3: keep the 128-lane padded compute in vregs; only the store narrows.
        out = jnp.dot(h2.astype(w3_ref.dtype), w3_ref[...],
                      preferred_element_type=jnp.float32)
        out = out + b3_ref[...]
        o_ref[...] = out[:, :out_size].astype(o_ref.dtype)

    return kernel


# ----------------------------- Param preparation -----------------------------
def init_qnetwork_params(key, input_size, output_size, cat_dims, embed_dim=4):
    n_cat = len(cat_dims)
    fc_input_size = input_size - n_cat + n_cat * embed_dim

    keys = jax.random.split(key, n_cat + 6)
    # Embedding tables (nn.Embedding default init ~ N(0,1)).
    emb_tables = [
        jax.random.normal(keys[i], (cat_dims[i], embed_dim), dtype=jnp.float32)
        for i in range(n_cat)
    ]

    def linear_init(kw, kb, fan_in, fan_out):
        bound = 1.0 / jnp.sqrt(fan_in)
        w = jax.random.uniform(kw, (fan_in, fan_out), jnp.float32, -bound, bound)
        b = jax.random.uniform(kb, (1, fan_out), jnp.float32, -bound, bound)
        return w, b

    w1, b1 = linear_init(keys[n_cat + 0], keys[n_cat + 1], fc_input_size, 128)
    w2, b2 = linear_init(keys[n_cat + 2], keys[n_cat + 3], 128, 64)
    w3, b3 = linear_init(keys[n_cat + 4], keys[n_cat + 5], 64, output_size)

    return dict(emb_tables=emb_tables, w1=w1, b1=b1, w2=w2, b2=b2, w3=w3, b3=b3)


def prepare_qnetwork_params(params, *, compute_dtype=jnp.bfloat16):
    """One-time padding / casting / embedding-fusion (hoisted out of the forward)."""
    emb_tables = params["emb_tables"]
    w1, b1 = params["w1"], params["b1"]
    w2, b2 = params["w2"], params["b2"]
    w3, b3 = params["w3"], params["b3"]

    n_cat = len(emb_tables)
    embed_dim = emb_tables[0].shape[1] if n_cat else 0
    fc_in = w1.shape[0]
    num_numeric = fc_in - n_cat * embed_dim
    h2_dim = w2.shape[1]
    out_size = w3.shape[1]
    hp = jax.lax.Precision.HIGHEST

    # Numeric slice of W1; fold each embedding table into its W1 rows.
    w1n = w1[:num_numeric].astype(compute_dtype)
    fused = []
    for i, tbl in enumerate(emb_tables):
        lo = num_numeric + i * embed_dim
        f = jnp.dot(tbl, w1[lo:lo + embed_dim], precision=hp)   # (cat_dim, 128) f32
        cdp = _round_up(tbl.shape[0], 8)
        f = jnp.pad(f, ((0, cdp - tbl.shape[0]), (0, 0)))
        fused.append(f.astype(compute_dtype))

    # Lane-dense padding of the hidden 64 dim (zero pads preserved by ReLU / zero rows).
    h2_pad = _round_up(h2_dim, 128)
    n_pad = _round_up(out_size, 128)
    w2p = jnp.pad(w2, ((0, 0), (0, h2_pad - h2_dim))).astype(compute_dtype)
    w3p = jnp.pad(w3, ((0, h2_pad - h2_dim), (0, n_pad - out_size))).astype(compute_dtype)
    b1p = b1.astype(jnp.float32)
    b2p = jnp.pad(b2, ((0, 0), (0, h2_pad - h2_dim))).astype(jnp.float32)
    b3p = jnp.pad(b3, ((0, 0), (0, n_pad - out_size))).astype(jnp.float32)

    return dict(w1n=w1n, fused=tuple(fused), b1=b1p, w2=w2p, b2=b2p, w3=w3p, b3=b3p,
                num_numeric=num_numeric, out_size=out_size, compute_dtype=compute_dtype)


# ----------------------------- Forward wrapper --------------------------------
def qnetwork_forward(prepared, x, cat_features, *, block_b=2048):
    # Match PyTorch semantics: promote 1-D inputs to a batch of 1.
    if cat_features.ndim == 1:
        cat_features = cat_features[None, :]
    if x.ndim == 1:
        x = x[None, :]

    compute_dtype = prepared["compute_dtype"]
    num_numeric = prepared["num_numeric"]
    out_size = prepared["out_size"]
    fused = prepared["fused"]
    n_cat = len(fused)

    B = x.shape[0]
    assert x.shape[1] == num_numeric, (x.shape, num_numeric)
    assert cat_features.shape == (B, n_cat), cat_features.shape

    # Batch tiling: big tiles amortize per-step overhead, but keep >=4 grid steps so
    # v7x's two TensorCores both get work (batch axis is "parallel").
    b16 = _round_up(B, 16)
    tb = min(_round_up(block_b, 16), max(16, _round_up(pl.cdiv(b16, 4), 16)))
    b_pad = _round_up(B, tb)
    grid = b_pad // tb

    # Single fused cast+pad pass over the activations (padded rows sliced away below).
    x_p = jnp.pad(x.astype(compute_dtype), ((0, b_pad - B), (0, 0)))
    cat_p = jnp.pad(cat_features.astype(jnp.int32), ((0, b_pad - B), (0, 0)))

    w1n, b1, w2, b2, w3, b3 = (prepared["w1n"], prepared["b1"], prepared["w2"],
                               prepared["b2"], prepared["w3"], prepared["b3"])

    # Same block every step -> stays VMEM-resident.
    # TODO(synk): add pipeline_mode=pl.Buffered(1) on resident specs once single-buffer
    # pipeline mode is confirmed on the target jax version (trivial VMEM saving).
    def resident(shape):
        return pl.BlockSpec(shape, lambda i: (0, 0))

    in_specs = (
        [pl.BlockSpec((tb, num_numeric), lambda i: (i, 0)),   # batch-tiled numeric x
         pl.BlockSpec((tb, n_cat), lambda i: (i, 0)),         # batch-tiled cat indices
         resident(w1n.shape)]
        + [resident(f.shape) for f in fused]
        + [resident(b1.shape), resident(w2.shape), resident(b2.shape),
           resident(w3.shape), resident(b3.shape)]
    )

    itemsize = jnp.dtype(compute_dtype).itemsize
    h1_dim = w1n.shape[1]
    flops = 2 * b_pad * (num_numeric * h1_dim
                         + sum(f.shape[0] for f in fused) * h1_dim
                         + w2.shape[0] * w2.shape[1]
                         + w3.shape[0] * w3.shape[1])
    bytes_accessed = (
        b_pad * num_numeric * itemsize + b_pad * n_cat * 4
        + (w1n.size + sum(f.size for f in fused) + w2.size + w3.size) * itemsize
        + (b1.size + b2.size + b3.size) * 4
        + b_pad * out_size * 4)

    out = pl.pallas_call(
        _make_qnet_kernel(n_cat, out_size),
        out_shape=jax.ShapeDtypeStruct((b_pad, out_size), jnp.float32),
        grid_spec=pl.GridSpec(
            grid=(grid,),
            in_specs=in_specs,
            out_specs=pl.BlockSpec((tb, out_size), lambda i: (i, 0)),
        ),
        compiler_params=pltpu.CompilerParams(
            dimension_semantics=("parallel",),      # shard batch tiles across TCs
            vmem_limit_bytes=32 * 1024 * 1024,
        ),
        cost_estimate=pl.CostEstimate(flops=flops, transcendentals=0,
                                      bytes_accessed=bytes_accessed),
    )(x_p, cat_p, w1n, *fused, b1, w2, b2, w3, b3)

    return out[:B]


# ----------------------------- Pure-JAX reference -----------------------------
def qnetwork_forward_ref(params, x, cat_features):
    if cat_features.ndim == 1:
        cat_features = cat_features[None, :]
    if x.ndim == 1:
        x = x[None, :]
    hp = jax.lax.Precision.HIGHEST
    embedded = [jnp.take(tbl, cat_features[:, i], axis=0)
                for i, tbl in enumerate(params["emb_tables"])]
    h = jnp.concatenate([x.astype(jnp.float32)] + embedded, axis=1)
    h = jnp.maximum(jnp.dot(h, params["w1"], precision=hp) + params["b1"], 0.0)
    h = jnp.maximum(jnp.dot(h, params["w2"], precision=hp) + params["b2"], 0.0)
    return jnp.dot(h, params["w3"], precision=hp) + params["b3"]


if __name__ == "__main__":
    # input_size = 12 total features, 2 categorical -> 10 numeric; embed_dim=4
    # -> fc_input_size = 18.
    input_size = 12
    output_size = 4
    cat_dims = [5, 7]
    embed_dim = 4

    key = jax.random.PRNGKey(0)
    kp, kx, kc = jax.random.split(key, 3)
    params = init_qnetwork_params(kp, input_size, output_size, cat_dims, embed_dim)
    num_numeric = input_size - len(cat_dims)

    prep_f32 = prepare_qnetwork_params(params, compute_dtype=jnp.float32)
    prep_bf16 = prepare_qnetwork_params(params)   # bf16 default fast path (v6e/v7x)

    def make_inputs(batch, kx_, kc_):
        x_ = jax.random.normal(kx_, (batch, num_numeric), dtype=jnp.float32)
        cat_ = jnp.stack(
            [jax.random.randint(jax.random.fold_in(kc_, i), (batch,), 0, cat_dims[i])
             for i in range(len(cat_dims))],
            axis=1,
        ).astype(jnp.int32)
        return x_, cat_

    # Tolerances are kept conservative to cover MXU f32 pass-decomposition differences
    # across TPU generations; expected error on the f32 path is ~1e-5.
    # 1) Small batch, f32 MXU path.
    x, cat = make_inputs(2, kx, kc)
    out = jax.block_until_ready(qnetwork_forward(prep_f32, x, cat))
    ref = qnetwork_forward_ref(params, x, cat)
    assert out.shape == (2, output_size), out.shape
    assert jnp.allclose(out, ref, atol=1e-2, rtol=1e-2), "f32 mismatch vs reference"

    # 2) Batch not divisible by the tile -> batch padding + a grid of 4 parallel steps.
    kx2, kc2 = jax.random.split(jax.random.fold_in(key, 1))
    x2, cat2 = make_inputs(300, kx2, kc2)
    out2 = jax.block_until_ready(qnetwork_forward(prep_f32, x2, cat2, block_b=128))
    ref2 = qnetwork_forward_ref(params, x2, cat2)
    assert out2.shape == (300, output_size), out2.shape
    assert jnp.allclose(out2, ref2, atol=1e-2, rtol=1e-2), "tiled f32 mismatch"

    # 3) bf16 MXU inputs (default fast path), f32 accumulation, looser tolerance.
    out3 = jax.block_until_ready(qnetwork_forward(prep_bf16, x2, cat2))
    assert out3.shape == (300, output_size), out3.shape
    assert jnp.allclose(out3, ref2, atol=5e-2, rtol=5e-2), "bf16 mismatch"

    # 4) 1-D inputs promote to a batch of 1 (PyTorch semantics).
    out4 = jax.block_until_ready(qnetwork_forward(prep_f32, x[0], cat[0]))
    assert out4.shape == (1, output_size), out4.shape
    assert jnp.allclose(out4, ref[0:1], atol=1e-2, rtol=1e-2), "1-D promotion mismatch"

    print("KERNEL_OK")
</pallas_src>

<mosaic_0001>
module attributes {stable_mosaic.version = 11 : i64} {
  func.func @kernel(%arg0: i32, %arg1: memref<16x10xf32, #tpu.memory_space<vmem>>, %arg2: memref<16x2xi32, #tpu.memory_space<vmem>>, %arg3: memref<10x128xf32, #tpu.memory_space<vmem>>, %arg4: memref<8x128xf32, #tpu.memory_space<vmem>>, %arg5: memref<8x128xf32, #tpu.memory_space<vmem>>, %arg6: memref<1x128xf32, #tpu.memory_space<vmem>>, %arg7: memref<128x128xf32, #tpu.memory_space<vmem>>, %arg8: memref<1x128xf32, #tpu.memory_space<vmem>>, %arg9: memref<128x128xf32, #tpu.memory_space<vmem>>, %arg10: memref<1x128xf32, #tpu.memory_space<vmem>>, %arg11: memref<16x4xf32, #tpu.memory_space<vmem>>) attributes {dimension_semantics = [#tpu.dimension_semantics<parallel>], iteration_bounds = array<i64: 1>, scalar_prefetch = 0 : i64, scratch_operands = 0 : i64, tpu.core_type = #tpu.core_type<tc>, window_params = [{transform_indices = @transform_0, window_bounds = array<i64: 16, 10>}, {transform_indices = @transform_1, window_bounds = array<i64: 16, 2>}, {pipeline_mode = #tpu.pipeline_mode<synchronous>, transform_indices = @transform_2, window_bounds = array<i64: 10, 128>}, {pipeline_mode = #tpu.pipeline_mode<synchronous>, transform_indices = @transform_3, window_bounds = array<i64: 8, 128>}, {pipeline_mode = #tpu.pipeline_mode<synchronous>, transform_indices = @transform_4, window_bounds = array<i64: 8, 128>}, {pipeline_mode = #tpu.pipeline_mode<synchronous>, transform_indices = @transform_5, window_bounds = array<i64: 1, 128>}, {pipeline_mode = #tpu.pipeline_mode<synchronous>, transform_indices = @transform_6, window_bounds = array<i64: 128, 128>}, {pipeline_mode = #tpu.pipeline_mode<synchronous>, transform_indices = @transform_7, window_bounds = array<i64: 1, 128>}, {pipeline_mode = #tpu.pipeline_mode<synchronous>, transform_indices = @transform_8, window_bounds = array<i64: 128, 128>}, {pipeline_mode = #tpu.pipeline_mode<synchronous>, transform_indices = @transform_9, window_bounds = array<i64: 1, 128>}, {transform_indices = @transform_10, window_bounds = array<i64: 16, 4>}]} {
    %c0 = arith.constant 0 : index
    %c0_0 = arith.constant 0 : index
    %0 = vector.load %arg1[%c0, %c0_0] : memref<16x10xf32, #tpu.memory_space<vmem>>, vector<16x10xf32>
    %c0_1 = arith.constant 0 : index
    %c0_2 = arith.constant 0 : index
    %1 = vector.load %arg3[%c0_1, %c0_2] : memref<10x128xf32, #tpu.memory_space<vmem>>, vector<10x128xf32>
    %cst = arith.constant dense<0.000000e+00> : vector<16x128xf32>
    %2 = tpu.matmul %0, %1, %cst {dimension_numbers = #tpu.dot_dimension_numbers<[1], [0], [0], [1], [0, 0, 1, 1], [], []>} : vector<16x10xf32>, vector<10x128xf32>, vector<16x128xf32> -> vector<16x128xf32>
    %c0_3 = arith.constant 0 : index
    %c0_4 = arith.constant 0 : index
    %3 = vector.load %arg2[%c0_3, %c0_4] : memref<16x2xi32, #tpu.memory_space<vmem>>, vector<16x2xi32>
    %4 = tpu.iota {dimensions = array<i32: 1>} : vector<16x8xi32>
    %5 = vector.extract_strided_slice %3 {offsets = [0, 0], sizes = [16, 1], strides = [1, 1]} : vector<16x2xi32> to vector<16x1xi32>
    %6 = vector.broadcast %5 : vector<16x1xi32> to vector<16x8xi32>
    %7 = arith.cmpi eq, %6, %4 : vector<16x8xi32>
    %8 = arith.extui %7 : vector<16x8xi1> to vector<16x8xi32>
    %9 = arith.sitofp %8 : vector<16x8xi32> to vector<16x8xf32>
    %c0_5 = arith.constant 0 : index
    %c0_6 = arith.constant 0 : index
    %10 = vector.load %arg4[%c0_5, %c0_6] : memref<8x128xf32, #tpu.memory_space<vmem>>, vector<8x128xf32>
    %cst_7 = arith.constant dense<0.000000e+00> : vector<16x128xf32>
    %11 = tpu.matmul %9, %10, %cst_7 {dimension_numbers = #tpu.dot_dimension_numbers<[1], [0], [0], [1], [0, 0, 1, 1], [], []>} : vector<16x8xf32>, vector<8x128xf32>, vector<16x128xf32> -> vector<16x128xf32>
    %12 = arith.addf %2, %11 : vector<16x128xf32>
    %13 = tpu.iota {dimensions = array<i32: 1>} : vector<16x8xi32>
    %14 = vector.extract_strided_slice %3 {offsets = [0, 1], sizes = [16, 1], strides = [1, 1]} : vector<16x2xi32> to vector<16x1xi32>
    %15 = vector.broadcast %14 : vector<16x1xi32> to vector<16x8xi32>
    %16 = arith.cmpi eq, %15, %13 : vector<16x8xi32>
    %17 = arith.extui %16 : vector<16x8xi1> to vector<16x8xi32>
    %18 = arith.sitofp %17 : vector<16x8xi32> to vector<16x8xf32>
    %c0_8 = arith.constant 0 : index
    %c0_9 = arith.constant 0 : index
    %19 = vector.load %arg5[%c0_8, %c0_9] : memref<8x128xf32, #tpu.memory_space<vmem>>, vector<8x128xf32>
    %cst_10 = arith.constant dense<0.000000e+00> : vector<16x128xf32>
    %20 = tpu.matmul %18, %19, %cst_10 {dimension_numbers = #tpu.dot_dimension_numbers<[1], [0], [0], [1], [0, 0, 1, 1], [], []>} : vector<16x8xf32>, vector<8x128xf32>, vector<16x128xf32> -> vector<16x128xf32>
    %21 = arith.addf %12, %20 : vector<16x128xf32>
    %c0_11 = arith.constant 0 : index
    %c0_12 = arith.constant 0 : index
    %22 = vector.load %arg6[%c0_11, %c0_12] : memref<1x128xf32, #tpu.memory_space<vmem>>, vector<1x128xf32>
    %23 = vector.broadcast %22 : vector<1x128xf32> to vector<16x128xf32>
    %24 = arith.addf %21, %23 : vector<16x128xf32>
    %cst_13 = arith.constant 0.000000e+00 : f32
    %25 = vector.broadcast %cst_13 : f32 to vector<16x128xf32>
    %26 = arith.maximumf %24, %25 : vector<16x128xf32>
    %c0_14 = arith.constant 0 : index
    %c0_15 = arith.constant 0 : index
    %27 = vector.load %arg7[%c0_14, %c0_15] : memref<128x128xf32, #tpu.memory_space<vmem>>, vector<128x128xf32>
    %cst_16 = arith.constant dense<0.000000e+00> : vector<16x128xf32>
    %28 = tpu.matmul %26, %27, %cst_16 {dimension_numbers = #tpu.dot_dimension_numbers<[1], [0], [0], [1], [0, 0, 1, 1], [], []>} : vector<16x128xf32>, vector<128x128xf32>, vector<16x128xf32> -> vector<16x128xf32>
    %c0_17 = arith.constant 0 : index
    %c0_18 = arith.constant 0 : index
    %29 = vector.load %arg8[%c0_17, %c0_18] : memref<1x128xf32, #tpu.memory_space<vmem>>, vector<1x128xf32>
    %30 = vector.broadcast %29 : vector<1x128xf32> to vector<16x128xf32>
    %31 = arith.addf %28, %30 : vector<16x128xf32>
    %cst_19 = arith.constant 0.000000e+00 : f32
    %32 = vector.broadcast %cst_19 : f32 to vector<16x128xf32>
    %33 = arith.maximumf %31, %32 : vector<16x128xf32>
    %c0_20 = arith.constant 0 : index
    %c0_21 = arith.constant 0 : index
    %34 = vector.load %arg9[%c0_20, %c0_21] : memref<128x128xf32, #tpu.memory_space<vmem>>, vector<128x128xf32>
    %cst_22 = arith.constant dense<0.000000e+00> : vector<16x128xf32>
    %35 = tpu.matmul %33, %34, %cst_22 {dimension_numbers = #tpu.dot_dimension_numbers<[1], [0], [0], [1], [0, 0, 1, 1], [], []>} : vector<16x128xf32>, vector<128x128xf32>, vector<16x128xf32> -> vector<16x128xf32>
    %c0_23 = arith.constant 0 : index
    %c0_24 = arith.constant 0 : index
    %36 = vector.load %arg10[%c0_23, %c0_24] : memref<1x128xf32, #tpu.memory_space<vmem>>, vector<1x128xf32>
    %37 = vector.broadcast %36 : vector<1x128xf32> to vector<16x128xf32>
    %38 = arith.addf %35, %37 : vector<16x128xf32>
    %39 = vector.extract_strided_slice %38 {offsets = [0, 0], sizes = [16, 4], strides = [1, 1]} : vector<16x128xf32> to vector<16x4xf32>
    %c0_25 = arith.constant 0 : index
    %c0_26 = arith.constant 0 : index
    %40 = vector.load %arg11[%c0_25, %c0_26] : memref<16x4xf32, #tpu.memory_space<vmem>>, vector<16x4xf32>
    tpu.vector_store %arg11[%c0_25, %c0_26], %39 {strides = array<i32>} : memref<16x4xf32, #tpu.memory_space<vmem>>, vector<16x4xf32>,
    return
  }
  func.func @transform_0(%arg0: i32) -> (i32, i32) {
    %c0_i32 = arith.constant 0 : i32
    %c0_i32_0 = arith.constant 0 : i32
    return %arg0, %c0_i32 : i32, i32
  }
  func.func @transform_1(%arg0: i32) -> (i32, i32) {
    %c0_i32 = arith.constant 0 : i32
    %c0_i32_0 = arith.constant 0 : i32
    return %arg0, %c0_i32 : i32, i32
  }
  func.func @transform_2(%arg0: i32) -> (i32, i32) {
    %c0_i32 = arith.constant 0 : i32
    %c0_i32_0 = arith.constant 0 : i32
    %c0_i32_1 = arith.constant 0 : i32
    return %c0_i32, %c0_i32_0 : i32, i32
  }
  func.func @transform_3(%arg0: i32) -> (i32, i32) {
    %c0_i32 = arith.constant 0 : i32
    %c0_i32_0 = arith.constant 0 : i32
    %c0_i32_1 = arith.constant 0 : i32
    return %c0_i32, %c0_i32_0 : i32, i32
  }
  func.func @transform_4(%arg0: i32) -> (i32, i32) {
    %c0_i32 = arith.constant 0 : i32
    %c0_i32_0 = arith.constant 0 : i32
    %c0_i32_1 = arith.constant 0 : i32
    return %c0_i32, %c0_i32_0 : i32, i32
  }
  func.func @transform_5(%arg0: i32) -> (i32, i32) {
    %c0_i32 = arith.constant 0 : i32
    %c0_i32_0 = arith.constant 0 : i32
    %c0_i32_1 = arith.constant 0 : i32
    return %c0_i32, %c0_i32_0 : i32, i32
  }
  func.func @transform_6(%arg0: i32) -> (i32, i32) {
    %c0_i32 = arith.constant 0 : i32
    %c0_i32_0 = arith.constant 0 : i32
    %c0_i32_1 = arith.constant 0 : i32
    return %c0_i32, %c0_i32_0 : i32, i32
  }
  func.func @transform_7(%arg0: i32) -> (i32, i32) {
    %c0_i32 = arith.constant 0 : i32
    %c0_i32_0 = arith.constant 0 : i32
    %c0_i32_1 = arith.constant 0 : i32
    return %c0_i32, %c0_i32_0 : i32, i32
  }
  func.func @transform_8(%arg0: i32) -> (i32, i32) {
    %c0_i32 = arith.constant 0 : i32
    %c0_i32_0 = arith.constant 0 : i32
    %c0_i32_1 = arith.constant 0 : i32
    return %c0_i32, %c0_i32_0 : i32, i32
  }
  func.func @transform_9(%arg0: i32) -> (i32, i32) {
    %c0_i32 = arith.constant 0 : i32
    %c0_i32_0 = arith.constant 0 : i32
    %c0_i32_1 = arith.constant 0 : i32
    return %c0_i32, %c0_i32_0 : i32, i32
  }
  func.func @transform_10(%arg0: i32) -> (i32, i32) {
    %c0_i32 = arith.constant 0 : i32
    %c0_i32_0 = arith.constant 0 : i32
    return %arg0, %c0_i32 : i32, i32
  }
}

</mosaic_0001>

<bundles_post_ra>
// kernel: tpu_custom_call.1
= control target key start
LH: loop header
LB: loop body
LE: loop exit
PB: predicated region body
PF: predicated region fallthrough
CT: control target
= control target key end

     0   :  { %15 = vsyncpa [#allocation3], 0  ;;  %s642_s0 = inlined_call_operand.vmem [shape: f32[16,10], index: 0, kind: input, shape index: {}]   ;;  %s643_s1 = inlined_call_operand.vmem [shape: s32[16,2], index: 1, kind: input, shape index: {}]   ;;  %s644_s2 = inlined_call_operand.hbm [shape: f32[10,128], index: 2, kind: input, shape index: {}]   ;;  %s645_s3 = inlined_call_operand.hbm [shape: f32[8,128], index: 3, kind: input, shape index: {}]   ;;  %s646_s4 = inlined_call_operand.hbm [shape: f32[8,128], index: 4, kind: input, shape index: {}]   ;;  %s647_s5 = inlined_call_operand.vmem [shape: f32[1,128], index: 5, kind: input, shape index: {}]   ;;  %s648_s6 = inlined_call_operand.hbm [shape: f32[128,128], index: 6, kind: input, shape index: {}]   ;;  %s649_s7 = inlined_call_operand.vmem [shape: f32[1,128], index: 7, kind: input, shape index: {}]   ;;  %s650_s8 = inlined_call_operand.hbm [shape: f32[128,128], index: 8, kind: input, shape index: {}]   ;;  %s651_s9 = inlined_call_operand.vmem [shape: f32[1,128], index: 9, kind: input, shape index: {}]   ;;  %s652_s10 = inlined_call_operand.vmem [shape: f32[16,4], index: 10, kind: output, shape index: {}]  }
   0x1   :  { %16 = vsyncpa [#allocation5], 0  ;;  %s40_s15 = sshll.u32 %s645_s3, 4  ;;  %s41_s15 = int_to_ptr.hbm [resolvable:$true] %s40_s15 }
   0x2   :  { %17 = vsyncpa [#allocation8], 0  ;;  %s531_s16 = smov [#allocation4]   ;;  %s63_s20 = sshll.u32 %s648_s6, 4  ;;  %s64_s20 = int_to_ptr.hbm [resolvable:$true] %s63_s20 }
   0x3   :  { %s42_s17 = sshll.u32 %s531_s16, 4  ;;  %s532_s21 = smov [#allocation7]   ;;  %s43_s17 = int_to_ptr.vmem [resolvable:$true] %s42_s17 }
   0x4   :  { %45 = dma.hbm_to_vmem [thread:$0]  %s41_s15, 128, %s43_s17, [#allocation5]  }
   0x5   :  { %s65_s22 = sshll.u32 %s532_s21, 4  ;;  %s26_s25 = sshll.u32 %s644_s2, 4  ;;  %s66_s22 = int_to_ptr.vmem [resolvable:$true] %s65_s22  ;;  %s27_s25 = int_to_ptr.hbm [resolvable:$true] %s26_s25 }
   0x6   :  { %s533_s3 = smov 128   ;;  %s534_s26 = smov 8  }
   0x7   :  { %71 = dma.hbm_to_vmem [thread:$0]  %s64_s20, 2048, %s66_s22, [#allocation8], %s533_s3, %s533_s3, %s534_s26  }
   0x8   :  { %s51_s29 = sshll.u32 %s646_s4, 4  ;;  %s535_s30 = smov [#allocation2]   ;;  %s52_s29 = int_to_ptr.hbm [resolvable:$true] %s51_s29 }
   0x9   :  { %s28_s11 = sshll.u32 %s535_s30, 4  ;;  %s536_s6 = smov [#allocation6]   ;;  %s29_s11 = int_to_ptr.vmem [resolvable:$true] %s28_s11 }
   0xa   :  { %34 = dma.hbm_to_vmem [thread:$0]  %s27_s25, 256, %s29_s11, [#allocation3], %s533_s3, %s533_s3, %s534_s26  }
   0xb   :  { %s53_s12 = sshll.u32 %s536_s6, 4  ;;  %s78_s2 = sshll.u32 %s650_s8, 4  ;;  %s54_s12 = int_to_ptr.vmem [resolvable:$true] %s53_s12  ;;  %s79_s2 = int_to_ptr.hbm [resolvable:$true] %s78_s2 }
   0xc   :  { %56 = dma.hbm_to_vmem [thread:$0]  %s52_s29, 128, %s54_s12, [#allocation5]  }
   0xd   :  { %s537_s15 = smov [#allocation9]  }
   0xe   :  { %s80_s16 = sshll.u32 %s537_s15, 4  ;;  %s81_s16 = int_to_ptr.vmem [resolvable:$true] %s80_s16 }
   0xf   :  { %86 = dma.hbm_to_vmem [thread:$0]  %s79_s2, 2048, %s81_s16, [#allocation8], %s533_s3, %s533_s3, %s534_s26  }
  0x10   :  { %525 = dma.done.wait [#allocation3], 256  }
  0x11   :  { %526 = vsyncadd [#allocation3], 4294967040 }
  0x12   :  { %527 = dma.done.wait [#allocation5], 256  }
  0x13   :  { %528 = vsyncadd [#allocation5], 4294967040 }
  0x14   :  { %529 = dma.done.wait [#allocation8], 4096  }
  0x15   :  { %530 = vsyncadd [#allocation8], 4294963200  ;;  %v538_v0 = vmov 1   ;;  %v113_v1 = vld [vmem:[%s643_s1] sm:$0xff]  ;;  %v114_v2 = vld [vmem:[%s643_s1 + $0x8] sm:$0xff]  ;;  %v539_v3 = vmov 0   ;;  %v115_v14 = vlaneseq }
  0x16   :  { %397 = vset.pattern.permute.xlu0 %v538_v0  ;;  %399 = vset.pattern.permute.xlu1 %v538_v0  ;;  %v206_v4 = vld [vmem:[#allocation6] sm:$0xff]  ;;  %v112_v5 = vld [vmem:[#allocation2 + $0x8] sm:$0x3]  ;;  %vm167_vm0 = vcmask 1041408   ;;  %v129_v6 = vld [vmem:[#allocation4] sm:$0xff]  ;;  %vm160_vm1 = vcmask 80896  }
  0x17   :  { %195 = vperm.xlu0 %397, %v113_v1   ;;  %198 = vperm.xlu1 %399, %v114_v2   ;;  %v111_v7 = vld [vmem:[#allocation2] sm:$0xff]  ;;  %v110_v9 = vld [vmem:[%s642_s0 + $0x8] sm:$0xff]  ;;  %v261_v10 = vld [vmem:[#allocation7 + $0x78] sm:$0xff]  ;;  %v116_v17 = vand.u32 127, %v115_v14  ;;  %vm130_vm2 = vcmask 64512   ;;  %v540_v22 = vmov 0.0  }
  0x18   :  { %228 = vmatpush.msra.mxu2 %v206_v4  ;;  %348 = vmatpush.msk.msra.mxu1 %vm167_vm0, %v112_v5  ;;  %v109_v8 = vld [vmem:[%s642_s0] sm:$0xff]  ;;  %v260_v11 = vld [vmem:[#allocation7 + $0x70] sm:$0xff]  ;;  %v259_v12 = vld [vmem:[#allocation7 + $0x68] sm:$0xff]  ;;  %vm334_vm7 = vcmask 31744  }
  0x19   :  { %152 = vmatpush.msra.mxu0 %v129_v6  ;;  %355 = vmatpush.msra.mxu3 %v261_v10  ;;  %v258_v13 = vld [vmem:[#allocation7 + $0x60] sm:$0xff]  ;;  %v257_v15 = vld [vmem:[#allocation7 + $0x58] sm:$0xff]  ;;  %v256_v16 = vld [vmem:[#allocation7 + $0x50] sm:$0xff] }
  0x1a   :  { %186 = vmatpush.msra.mxu1 %v111_v7  ;;  %v255_v18 = vld [vmem:[#allocation7 + $0x48] sm:$0xff]  ;;  %v254_v20 = vld [vmem:[#allocation7 + $0x40] sm:$0xff]  ;;  %v253_v24 = vld [vmem:[#allocation7 + $0x38] sm:$0xff] }
  0x1b   :  { %349 = vmatmul.msk.f32.vlgmr.msra.gmra.mxu1 %vm160_vm1, %v109_v8  ;;  %356 = vmatpush.msra.mxu3 %v260_v11  ;;  %v252_v25 = vld [vmem:[#allocation7 + $0x30] sm:$0xff]  ;;  %v251_v31 = vld [vmem:[#allocation7 + $0x28] sm:$0xff]  ;;  %v250_v32 = vld [vmem:[#allocation7 + $0x20] sm:$0xff] }
  0x1c   :  { %266 = vmatpush.msrb.mxu1 %v261_v10  ;;  %v249_v33 = vld [vmem:[#allocation7 + $0x18] sm:$0xff]  ;;  %v248_v34 = vld [vmem:[#allocation7 + $0x10] sm:$0xff]  ;;  %v247_v35 = vld [vmem:[#allocation7 + $0x8] sm:$0xff] }
  0x1d   :  { %357 = vmatpush.msra.mxu3 %v259_v12  ;;  %v246_v36 = vld [vmem:[#allocation7] sm:$0xff]  ;;  %v306_v37 = vld [vmem:[#allocation9 + $0x78] sm:$0xff]  ;;  %v305_v38 = vld [vmem:[#allocation9 + $0x70] sm:$0xff] }
  0x1e   :  { %267 = vmatpush.msrb.mxu1 %v260_v11  ;;  %311 = vmatpush.msrb.mxu0 %v306_v37  ;;  %v304_v39 = vld [vmem:[#allocation9 + $0x68] sm:$0xff]  ;;  %v303_v40 = vld [vmem:[#allocation9 + $0x60] sm:$0xff]  ;;  %v302_v41 = vld [vmem:[#allocation9 + $0x58] sm:$0xff] }
  0x1f   :  { %398 = vset.pattern.permute.xlu0 %v539_v3  ;;  %400 = vset.pattern.permute.xlu1 %v539_v3  ;;  %v301_v42 = vld [vmem:[#allocation9 + $0x50] sm:$0xff]  ;;  %v300_v43 = vld [vmem:[#allocation9 + $0x48] sm:$0xff]  ;;  %v299_v45 = vld [vmem:[#allocation9 + $0x40] sm:$0xff] }
  0x20   :  { %118 = vperm.xlu0 %398, %v113_v1   ;;  %121 = vperm.xlu1 %400, %v114_v2   ;;  %v298_v46 = vld [vmem:[#allocation9 + $0x38] sm:$0xff]  ;;  %v402_v50 = vld [vmem:[%s647_s5] ss:$0 sm:$0xff]  ;;  %v297_v51 = vld [vmem:[#allocation9 + $0x30] sm:$0xff] }
  0x21   :  { %268 = vmatpush.msrb.mxu1 %v259_v12  ;;  %358 = vmatpush.msra.mxu3 %v258_v13  ;;  %v296_v53 = vld [vmem:[#allocation9 + $0x28] sm:$0xff]  ;;  %v295_v55 = vld [vmem:[#allocation9 + $0x20] sm:$0xff]  ;;  %v294_v58 = vld [vmem:[#allocation9 + $0x18] sm:$0xff] }
  0x22   :  { %371 = vmatpush.msrb.mxu2 %v306_v37  ;;  %312 = vmatpush.msrb.mxu0 %v305_v38  ;;  %v293_v1 = vld [vmem:[#allocation9 + $0x10] sm:$0xff]  ;;  %v292_v2 = vld [vmem:[#allocation9 + $0x8] sm:$0xff]  ;;  %v291_v3 = vld [vmem:[#allocation9] sm:$0xff] }
  0x23   :  { %350 = vmatmul.msk.f32.gmra.mxu1 %vm160_vm1, %v110_v9  ;;  %359 = vmatpush.msra.mxu3 %v257_v15  ;;  %v403_v4 = vld [vmem:[%s649_s7] ss:$0 sm:$0xff] }
  0x24   :  { %269 = vmatpush.msrb.mxu1 %v258_v13  ;;  %372 = vmatpush.msrb.mxu2 %v305_v38  ;;  %v404_v11 = vld [vmem:[%s651_s9] ss:$0 sm:$0xff] }
  0x25   :  { %360 = vmatpush.msra.mxu3 %v256_v16  ;;  %313 = vmatpush.msrb.mxu0 %v304_v39 }
  0x26   :  { %270 = vmatpush.msrb.mxu1 %v257_v15  ;;  %373 = vmatpush.msrb.mxu2 %v304_v39 }
  0x27   :  { %361 = vmatpush.msra.mxu3 %v255_v18  ;;  %314 = vmatpush.msrb.mxu0 %v303_v40 }
  0x28   :  { %401 = vset.pattern.permute.xlu0 %v538_v0  ;;  %271 = vmatpush.msrb.mxu1 %v256_v16 }
  0x29   :  { %362 = vmatpush.msra.mxu3 %v254_v20  ;;  %374 = vmatpush.msrb.mxu2 %v303_v40 }
  0x2a   :  { %272 = vmatpush.msrb.mxu1 %v255_v18  ;;  %315 = vmatpush.msrb.mxu0 %v302_v41 }
  0x2b   :  { %363 = vmatpush.msra.mxu3 %v253_v24  ;;  %375 = vmatpush.msrb.mxu2 %v302_v41 }
  0x2c   :  { %273 = vmatpush.msrb.mxu1 %v254_v20  ;;  %316 = vmatpush.msrb.mxu0 %v301_v42 }
  0x2d   :  { %364 = vmatpush.msra.mxu3 %v252_v25  ;;  %376 = vmatpush.msrb.mxu2 %v301_v42 }
  0x2e   :  { %274 = vmatpush.msrb.mxu1 %v253_v24  ;;  %317 = vmatpush.msrb.mxu0 %v300_v43 }
  0x2f   :  { %365 = vmatpush.msra.mxu3 %v251_v31  ;;  %377 = vmatpush.msrb.mxu2 %v300_v43 }
  0x30   :  { %275 = vmatpush.msrb.mxu1 %v252_v25  ;;  %318 = vmatpush.msrb.mxu0 %v299_v45 }
  0x31   :  { %366 = vmatpush.msra.mxu3 %v250_v32  ;;  %378 = vmatpush.msrb.mxu2 %v299_v45 }
  0x32   :  { %276 = vmatpush.msrb.mxu1 %v251_v31  ;;  %319 = vmatpush.msrb.mxu0 %v298_v46 }
  0x33   :  { %367 = vmatpush.msra.mxu3 %v249_v33  ;;  %379 = vmatpush.msrb.mxu2 %v298_v46 }
  0x34   :  { %277 = vmatpush.msrb.mxu1 %v250_v32  ;;  %320 = vmatpush.msrb.mxu0 %v297_v51 }
  0x35   :  { %368 = vmatpush.msra.mxu3 %v248_v34  ;;  %380 = vmatpush.msrb.mxu2 %v297_v51 }
  0x36   :  { %278 = vmatpush.msrb.mxu1 %v249_v33  ;;  %321 = vmatpush.msrb.mxu0 %v296_v53 }
  0x37   :  { %369 = vmatpush.msra.mxu3 %v247_v35  ;;  %381 = vmatpush.msrb.mxu2 %v296_v53 }
  0x38   :  { %279 = vmatpush.msrb.mxu1 %v248_v34  ;;  %322 = vmatpush.msrb.mxu0 %v295_v55 }
  0x39   :  { %370 = vmatpush.msra.mxu3 %v246_v36  ;;  %382 = vmatpush.msrb.mxu2 %v295_v55 }
  0x3a   :  { %280 = vmatpush.msrb.mxu1 %v247_v35  ;;  %323 = vmatpush.msrb.mxu0 %v294_v58 }
  0x3b   :  { %383 = vmatpush.msrb.mxu2 %v294_v58 }
  0x3c   :  { %281 = vmatpush.msrb.mxu1 %v246_v36  ;;  %324 = vmatpush.msrb.mxu0 %v293_v1 }
  0x3d   :  { %384 = vmatpush.msrb.mxu2 %v293_v1 }
  0x3e   :  { %325 = vmatpush.msrb.mxu0 %v292_v2 }
  0x3f   :  { %385 = vmatpush.msrb.mxu2 %v292_v2 }
  0x40   :  { %326 = vmatpush.msrb.mxu0 %v291_v3 }
  0x41   :  { %386 = vmatpush.msrb.mxu2 %v291_v3 }
  0x89   :  { %v196_v19 = vpop.permute.xlu0 %195  ;;  %v199_v21 = vpop.permute.xlu1 %198 }
  0x8a   :  { %vm200_vm3 = vcmp.eq.s32.totalorder %v196_v19, %v116_v17  ;;  %vm201_vm4 = vcmp.eq.s32.totalorder %v199_v21, %v116_v17 }
  0x8b   :  { %v351_v23 = vsel %vm200_vm3, 1.0, %v540_v22  ;;  %v352_v26 = vsel %vm201_vm4, 1.0, %v540_v22 }
  0x8c   :  { %353 = vmatmul.msk.f32.vlgmr.msra.gmra.mxu2 %vm130_vm2, %v351_v23 }
  0x92   :  { %v119_v27 = vpop.permute.xlu0 %118  ;;  %v122_v29 = vpop.permute.xlu1 %121 }
  0x93   :  { %vm123_vm5 = vcmp.eq.s32.totalorder %v119_v27, %v116_v17  ;;  %vm124_vm6 = vcmp.eq.s32.totalorder %v122_v29, %v116_v17 }
  0x94   :  { %v344_v28 = vsel %vm123_vm5, 1.0, %v540_v22  ;;  %354 = vmatmul.msk.f32.gmra.mxu2 %vm130_vm2, %v352_v26  ;;  %v345_v30 = vsel %vm124_vm6, 1.0, %v540_v22 }
  0x95   :  { %346 = vmatmul.msk.f32.vlgmr.msra.gmra.mxu0 %vm130_vm2, %v344_v28 }
  0x98   :  { %v188_v44 = vpop.f32.mrf.mxu1 }
  0x9d   :  { %347 = vmatmul.msk.f32.gmra.mxu0 %vm130_vm2, %v345_v30 }
  0xa0   :  { %v191_v56 = vpop.f32.mrf.mxu1 }
 0x10f   :  { %v230_v47 = vpop.f32.mrf.mxu2 }
 0x112   :  { %v154_v48 = vpop.f32.mrf.mxu0 }
 0x113   :  { %v189_v49 = vadd.f32 %v188_v44, %v154_v48 }
 0x115   :  { %v236_v52 = vadd.f32 %v230_v47, %v189_v49 }
 0x117   :  { %v242_v54 = vadd.f32 %v402_v50, %v236_v52  ;;  %v233_v61 = vpop.f32.mrf.mxu2 }
 0x119   :  { %v244_v57 = vmax.f32 %v242_v54, 0.0 }
 0x11a   :  { %v157_v59 = vpop.f32.mrf.mxu0 }
 0x11b   :  { %v192_v60 = vadd.f32 %v191_v56, %v157_v59  ;;  %282 = vmatmul.f32.vlgmr.msrb.gmra.mxu1 %v244_v57 }
 0x11d   :  { %v237_v62 = vadd.f32 %v233_v61, %v192_v60 }
 0x11f   :  { %v243_v63 = vadd.f32 %v402_v50, %v237_v62 }
 0x121   :  { %v245_v0 = vmax.f32 %v243_v63, 0.0 }
 0x123   :  { %285 = vmatmul.f32.vlgmr.msra.gmra.mxu3 %v245_v0 }
 0x198   :  { %v283_v5 = vpop.f32.mrf.mxu1 }
 0x199   :  { %v284_v6 = vadd.f32 %v403_v4, %v283_v5 }
 0x19b   :  { %v289_v7 = vmax.f32 %v284_v6, 0.0 }
 0x19d   :  { %327 = vmatmul.f32.vlgmr.msrb.gmra.mxu0 %v289_v7 }
 0x1a6   :  { %v286_v8 = vpop.f32.mrf.mxu3 }
 0x1a7   :  { %v287_v9 = vadd.f32 %v403_v4, %v286_v8 }
 0x1a9   :  { %v290_v10 = vmax.f32 %v287_v9, 0.0 }
 0x1ab   :  { %330 = vmatmul.f32.vlgmr.msrb.gmra.mxu2 %v290_v10 }
 0x21a   :  { %v328_v12 = vpop.f32.mrf.mxu0 }
 0x21b   :  { %v329_v13 = vadd.f32 %v404_v11, %v328_v12 }
 0x21d   :  { %335 = vst.msk [vmem:[%s652_s10] sm:$0xff] %vm334_vm7, %v329_v13 }
 0x22e   :  { %v331_v14 = vpop.f32.mrf.mxu2 }
 0x22f   :  { %v332_v15 = vadd.f32 %v404_v11, %v331_v14 }
 0x231   :  { %336 = vst.msk [vmem:[%s652_s10 + $0x8] sm:$0xff] %vm334_vm7, %v332_v15 }
 0x232   :  { %341 = vsyncpa [#allocation3], 1 }
 0x233   :  { %342 = vsyncpa [#allocation5], 1 }
 0x234   :  { %343 = vsyncpa [#allocation8], 1 }

</bundles_post_ra>
